<compile_context>
chip_gen: v7x
topology: tpu7x:2x2x1
jax: 0.10.0
libtpu: 0.0.40
codegen_flags: <defaults>
</compile_context>

<pallas_src>
import jax
import jax.numpy as jnp
from jax.experimental import pallas as pl
from jax.experimental.pallas import tpu as pltpu


_LANE_CANDIDATES = (4096, 2048, 1024, 512, 256, 128)


def _vmem_capacity_bytes():
    """Physical VMEM of the local TPU; falls back to 128 MiB (v5e/v6e)."""
    try:
        return int(pltpu.get_tpu_info().vmem_capacity_bytes)
    except Exception:
        return 128 * 1024 * 1024


def _block_budget_and_vmem_limit():
    cap = _vmem_capacity_bytes()
    if cap >= 96 * 1024 * 1024:
        # v5e / v6e: 128 MiB physical VMEM -> 8 MiB blocks, 64 MiB scoped.
        return 8 * 1024 * 1024, 64 * 1024 * 1024
    # v7x: 64 MiB physical VMEM -> 4 MiB blocks, 44 MiB scoped (headroom).
    return 4 * 1024 * 1024, 44 * 1024 * 1024


def _choose_cols(n):
    """Widest lane-dense column count dividing n, or None."""
    for c in _LANE_CANDIDATES:
        if n >= c and n % c == 0:
            return c
    return None


def _choose_row_tile(rows, cols, itemsize, target_block_bytes):
    """Row-tile size (multiple of the dtype's sublane packing, or full rows)."""
    sublane = max(8, 32 // itemsize)  # 8 f32, 16 bf16, 32 int8/fp8
    if rows <= sublane:
        return rows  # single full-extent block (always legal)
    tm = (target_block_bytes // (cols * itemsize)) // sublane * sublane
    tm = max(sublane, tm)
    # Keep >= 4 row tiles on anything bigger than ~1 MiB so the double-buffer
    # pipeline (and v7x's second TensorCore) actually engage.
    if rows * cols * itemsize > (1 << 20):
        tm = min(tm, max(sublane, (rows // 4) // sublane * sublane))
    return min(tm, rows)


def _scale_kernel(w_ref, x_ref, o_ref):
    # w_ref: (1, 1) f32 scalar in SMEM; x_ref / o_ref: (tm, cols) VMEM tiles.
    # Multiply in the tile's native dtype (bf16 VALU is free on v6e/v7x and
    # avoids doubling vreg footprint with an f32 upcast).
    # TODO(synk): PyTorch would promote bf16 * f32-parameter to f32; we keep
    # x.dtype (identical semantics for the f32 reference case).
    w = w_ref[0, 0].astype(o_ref.dtype)
    o_ref[...] = x_ref[...] * w


def gd_l2o_weight_forward(w_scalar, x):
    """Computes w * x with a tiled, lane-dense Pallas TPU kernel.

    w_scalar: python float or 0-d/1-element array (the nn.Parameter).
    x: array of any shape (NCHW in the reference); same shape/dtype returned.
    """
    orig_shape = x.shape
    dtype = x.dtype
    total = int(x.size)
    if total == 0:
        return x

    w_arr = jnp.asarray(w_scalar, dtype=jnp.float32).reshape(1, 1)
    w_native = w_arr[0, 0].astype(dtype)

    flat = x.reshape(-1)

    # ---- split into a 128-aligned prefix (kernel) and a tiny tail (JAX) ----
    cols = _choose_cols(total)
    if cols is not None:
        aligned, tail = total, 0
    else:
        aligned = (total // 128) * 128
        tail = total - aligned
        cols = _choose_cols(aligned) if aligned else None

    if aligned == 0:
        # Tiny tensor (< 128 elements): whole thing is the tail.
        return (flat * w_native).reshape(orig_shape)

    prefix = flat[:aligned] if tail else flat
    rows = aligned // cols
    x2d = prefix.reshape(rows, cols)

    # ---- generation-aware tiling -------------------------------------------
    itemsize = jnp.dtype(dtype).itemsize
    target_block_bytes, vmem_limit = _block_budget_and_vmem_limit()
    tm = _choose_row_tile(rows, cols, itemsize, target_block_bytes)
    grid = (pl.cdiv(rows, tm),)

    cost = pl.CostEstimate(
        flops=aligned,
        transcendentals=0,
        bytes_accessed=2 * aligned * itemsize + 4,
    )

    # TODO(synk): sweep pipeline_mode=pl.Buffered(3) on the input spec and
    # add input_output_aliases={1: 0} when the caller donates x.
    out2d = pl.pallas_call(
        _scale_kernel,
        out_shape=jax.ShapeDtypeStruct((rows, cols), dtype),
        grid_spec=pl.GridSpec(
            grid=grid,
            in_specs=[
                pl.BlockSpec(memory_space=pltpu.MemorySpace.SMEM),  # scalar w
                pl.BlockSpec((tm, cols), lambda i: (i, 0)),         # input tile
            ],
            out_specs=pl.BlockSpec((tm, cols), lambda i: (i, 0)),
        ),
        compiler_params=pltpu.CompilerParams(
            dimension_semantics=("parallel",),
            vmem_limit_bytes=vmem_limit,
        ),
        cost_estimate=cost,
    )(w_arr, x2d)

    out_flat = out2d.reshape(-1)
    if tail:
        out_flat = jnp.concatenate([out_flat, flat[aligned:] * w_native])
    return out_flat.reshape(orig_shape)


if __name__ == "__main__":
    key = jax.random.PRNGKey(0)
    # Small NCHW input consistent with the module's forward.
    x = jax.random.normal(key, (2, 4, 16, 16), dtype=jnp.float32)

    start_lr = 0.01  # nn.Parameter(torch.tensor(start_lr))
    w = jnp.float32(start_lr)

    out = jax.block_until_ready(gd_l2o_weight_forward(w, x))

    # Correctness check against the pure-JAX reference.
    ref = w * x
    assert out.shape == x.shape and out.dtype == x.dtype
    assert jnp.allclose(out, ref, rtol=1e-6, atol=1e-6)

    # Ragged shape exercising the aligned-prefix kernel + JAX tail path.
    x2 = jax.random.normal(jax.random.PRNGKey(1), (3, 7, 13), dtype=jnp.float32)
    out2 = jax.block_until_ready(gd_l2o_weight_forward(w, x2))
    assert jnp.allclose(out2, w * x2, rtol=1e-6, atol=1e-6)

    # Tiny (<128 element) tensor: pure tail path.
    x3 = jax.random.normal(jax.random.PRNGKey(2), (3, 5, 7), dtype=jnp.float32)
    out3 = jax.block_until_ready(gd_l2o_weight_forward(w, x3))
    assert jnp.allclose(out3, w * x3, rtol=1e-6, atol=1e-6)

    print("KERNEL_OK")
</pallas_src>

<mosaic_0001>
module attributes {stable_mosaic.version = 11 : i64} {
  func.func @_scale_kernel(%arg0: i32, %arg1: memref<1x1xf32, #tpu.memory_space<smem>>, %arg2: memref<1x2048xf32, #tpu.memory_space<vmem>>, %arg3: memref<1x2048xf32, #tpu.memory_space<vmem>>) attributes {dimension_semantics = [#tpu.dimension_semantics<parallel>], iteration_bounds = array<i64: 1>, scalar_prefetch = 0 : i64, scratch_operands = 0 : i64, tpu.core_type = #tpu.core_type<tc>, window_params = [{transform_indices = @transform_0, window_bounds = array<i64: 1, 1>}, {transform_indices = @transform_1, window_bounds = array<i64: 1, 2048>}, {transform_indices = @transform_2, window_bounds = array<i64: 1, 2048>}]} {
    %c0 = arith.constant 0 : index
    %c0_0 = arith.constant 0 : index
    %0 = memref.load %arg1[%c0, %c0_0] : memref<1x1xf32, #tpu.memory_space<smem>>
    %c0_1 = arith.constant 0 : index
    %c0_2 = arith.constant 0 : index
    %1 = vector.load %arg2[%c0_1, %c0_2] : memref<1x2048xf32, #tpu.memory_space<vmem>>, vector<1x2048xf32>
    %2 = vector.broadcast %0 : f32 to vector<1x2048xf32>
    %3 = arith.mulf %1, %2 : vector<1x2048xf32>
    %c0_3 = arith.constant 0 : index
    %c0_4 = arith.constant 0 : index
    %4 = vector.load %arg3[%c0_3, %c0_4] : memref<1x2048xf32, #tpu.memory_space<vmem>>, vector<1x2048xf32>
    tpu.vector_store %arg3[%c0_3, %c0_4], %3 {strides = array<i32>} : memref<1x2048xf32, #tpu.memory_space<vmem>>, vector<1x2048xf32>,
    return
  }
  func.func @transform_0(%arg0: i32) -> (i32, i32) {
    %c0_i32 = arith.constant 0 : i32
    %c0_i32_0 = arith.constant 0 : i32
    %c0_i32_1 = arith.constant 0 : i32
    return %c0_i32, %c0_i32_0 : i32, i32
  }
  func.func @transform_1(%arg0: i32) -> (i32, i32) {
    %c0_i32 = arith.constant 0 : i32
    %c0_i32_0 = arith.constant 0 : i32
    return %arg0, %c0_i32 : i32, i32
  }
  func.func @transform_2(%arg0: i32) -> (i32, i32) {
    %c0_i32 = arith.constant 0 : i32
    %c0_i32_0 = arith.constant 0 : i32
    return %arg0, %c0_i32 : i32, i32
  }
}

</mosaic_0001>

<bundles_post_ra>
// kernel: tpu_custom_call.1
= control target key start
LH: loop header
LB: loop body
LE: loop exit
PB: predicated region body
PF: predicated region fallthrough
CT: control target
= control target key end

     0   :  { %8 = vsyncpa [#allocation4], 0  ;;  %s142_s0 = inlined_call_operand.<no memory space> [shape: f32[1,1], index: 0, kind: input, shape index: {}]   ;;  %s143_s1 = inlined_call_operand.hbm [shape: f32[1,2048], index: 1, kind: input, shape index: {}]   ;;  %s144_s2 = inlined_call_operand.hbm [shape: f32[1,2048], index: 2, kind: output, shape index: {}]  }
   0x1   :  { %9 = vsyncpa [#allocation5], 0  ;;  %s98_s9 = smov [#allocation3]   ;;  %s50_s13 = scalar_lea.hbm %s143_s1, 256 }
   0x2   :  { %s18_s10 = sshll.u32 %s98_s9, 4  ;;  %p51_p0 = scmp.ne.s32.totalorder %s143_s1, %s50_s13  ;;  %s19_s10 = int_to_ptr.vmem [resolvable:$true] %s18_s10 }
   0x3   :  { %p54_p1 = scmp.lt.u32.totalorder %s50_s13, %s143_s1 }
   0x5   :  { %p56_p2 = pnand %p54_p1, %p51_p0 }
   0x7   :  { %59 = shalt.err (!%p56_p2)
}
   0x8   :  { %s60_s18 = scalar_lea.vmem %s19_s10, 256  ;;  %p65_p4 = scmp.lt.s32.totalorder %s19_s10, %s19_s10 }
   0x9   :  { %p61_p3 = scmp.ne.s32.totalorder %s19_s10, %s60_s18  ;;  %p66_p5 = scmp.lt.s32.totalorder %s60_s18, %s60_s18 }
   0xb   :  { %p67_p6 = por %p66_p5, %p65_p4 }
   0xd   :  { %p68_p7 = pnand %p67_p6, %p61_p3 }
   0xf   :  { %71 = shalt.err (!%p68_p7)
}
  0x10   :  { %21 = dma.hbm_to_vmem [thread:$0]  %s143_s1, 256, %s19_s10, [#allocation4]  }
  0x11   :  { %94 = dma.done.wait [#allocation4], 256  }
  0x12   :  { %95 = vsyncadd [#allocation4], 4294967040  ;;  %v28_v0 = vstv %s142_s0  ;;  %s99_s23 = smov [#allocation6]   ;;  %v26_v1 = vld [vmem:[#allocation3] sm:$0xff]  ;;  %v27_v2 = vld [vmem:[#allocation3 + $0x8] sm:$0xff] }
  0x13   :  { %s39_s24 = sshll.u32 %s99_s23, 4  ;;  %v29_v3 = vmul.f32 %v28_v0, %v26_v1  ;;  %v30_v4 = vmul.f32 %v28_v0, %v27_v2  ;;  %s40_s24 = int_to_ptr.vmem [resolvable:$true] %s39_s24 }
  0x14   :  { %s72_s25 = scalar_lea.vmem %s40_s24, 256  ;;  %p77_p9 = scmp.lt.s32.totalorder %s40_s24, %s40_s24 }
  0x15   :  { %31 = vst [vmem:[#allocation6] sm:$0xff] %v29_v3  ;;  %32 = vst [vmem:[#allocation6 + $0x8] sm:$0xff] %v30_v4  ;;  %p73_p8 = scmp.ne.s32.totalorder %s40_s24, %s72_s25  ;;  %p78_p10 = scmp.lt.s32.totalorder %s72_s25, %s72_s25 }
  0x17   :  { %p79_p11 = por %p78_p10, %p77_p9 }
  0x19   :  { %p80_p12 = pnand %p79_p11, %p73_p8 }
  0x1b   :  { %83 = shalt.err (!%p80_p12)
}
  0x1c   :  { %s84_s0 = scalar_lea.hbm %s144_s2, 256 }
  0x1d   :  { %p85_p13 = scmp.ne.s32.totalorder %s144_s2, %s84_s0  ;;  %p88_p0 = scmp.lt.u32.totalorder %s84_s0, %s144_s2 }
  0x1f   :  { %p90_p1 = pnand %p88_p0, %p85_p13 }
  0x21   :  { %93 = shalt.err (!%p90_p1)
}
  0x22   :  { %42 = dma.vmem_to_hbm [thread:$0]  %s40_s24, 256, %s144_s2, [#allocation5]  }
  0x23   :  { %96 = dma.done.wait [#allocation5], 256  }
  0x24   :  { %97 = vsyncadd [#allocation5], 4294967040 }
  0x25   :  { %46 = vsyncpa [#allocation4], 1 }
  0x26   :  { %47 = vsyncpa [#allocation5], 1 }

</bundles_post_ra>
